<compile_context>
chip_gen: v6e
topology: v6e:2x2x1
jax: 0.10.0
libtpu: 0.0.40
codegen_flags: <defaults>
</compile_context>

<pallas_src>
import functools

import jax
import jax.numpy as jnp
from jax import lax
from jax.experimental import pallas as pl
from jax.experimental.pallas import tpu as pltpu

IMG_RES = 500.0 / 2.0      # == self.img_res
LANE = 1024                # lane-dense columns: multiple of 128, even (x/y parity)


def _round_up(x, m):
    return ((x + m - 1) // m) * m


@functools.lru_cache(maxsize=1)
def _device_plan():
    """Returns (target_block_rows, vmem_limit_bytes or None, multi_core)."""
    kind = ""
    try:
        kind = jax.devices()[0].device_kind.lower()
    except Exception:
        pass
    if "v7" in kind:
        # 2048 * 1024 * 4 B = 8 MiB blocks; double-buffered in+out = 32 MiB,
        # which sits at the 32 MiB scoped default -> raise it (64 MiB physical).
        return 2048, 48 << 20, True
    if "v6" in kind:
        # 4 MiB blocks; 16 MiB pipeline fits the 32 MiB scoped default, but be explicit.
        return 1024, 48 << 20, False
    if "v5e" in kind or "v5 lite" in kind or "v5litepod" in kind:
        # 2 MiB blocks stay inside the 16 MiB scoped default with headroom.
        return 512, None, False
    # Unknown / older chips: conservative.
    return 512, None, False


def _plan_rows(rows_needed, target_rows, multi_core):
    """Pick (rows_per_block, num_blocks).

    rows_per_block is a multiple of 8 whenever num_blocks > 1 (the (8,128)
    rule); a single block may equal the full row count (legal even if not a
    multiple of 8).
    """
    if rows_needed <= 8:
        return rows_needed, 1
    if rows_needed <= target_rows:
        if multi_core and rows_needed >= 128:
            # Split into (at least) 2 blocks so both TensorCores get work.
            half = _round_up(pl.cdiv(rows_needed, 2), 8)
            if half < rows_needed:
                return half, pl.cdiv(rows_needed, half)
        return rows_needed, 1
    rows_per_block = target_rows
    num_blocks = pl.cdiv(rows_needed, rows_per_block)
    if multi_core and num_blocks > 1 and num_blocks % 2 == 1:
        # Re-balance to an even block count for the 2-TC parallel split.
        rows_per_block = _round_up(pl.cdiv(rows_needed, num_blocks + 1), 8)
        num_blocks = pl.cdiv(rows_needed, rows_per_block)
    return rows_per_block, num_blocks


def cam_kernel(cam_ref, xy_ref, out_ref):
    # cam_ref: SMEM (3,) f32 = [f, tx, ty]
    # xy_ref / out_ref: VMEM (rows_per_block, LANE) f32, x/y interleaved along lanes.
    s = cam_ref[0] * IMG_RES                  # scalar ALU (free)
    bias_x = cam_ref[1] * s + IMG_RES
    bias_y = cam_ref[2] * s + IMG_RES

    lane_w = out_ref.shape[-1]
    parity = lax.broadcasted_iota(jnp.int32, (1, lane_w), 1) & 1    # one vreg row
    bias = jnp.where(parity == 0, bias_x, bias_y)                   # (1, LANE)

    # 2 vector passes per element; VPU work is fully hidden under the DMA.
    out_ref[...] = xy_ref[...] * s + bias


@jax.jit
def optimize_cam_layer(pose3d, cam_param):
    """pose3d: (B, J, 3) f32, cam_param: (1, 3) f32 -> (B, J, 2) f32."""
    B, J, _ = pose3d.shape
    n = B * J * 2
    rows_needed = max(1, pl.cdiv(n, LANE))

    target_rows, vmem_limit, multi_core = _device_plan()
    rows_per_block, num_blocks = _plan_rows(rows_needed, target_rows, multi_core)

    # Pad only to the next LANE multiple (<= 4 KiB of pad; zero when n % LANE == 0).
    padded_n = rows_needed * LANE
    flat = pose3d[:, :, :2].astype(jnp.float32).reshape(-1)
    if padded_n > n:
        flat = jnp.pad(flat, (0, padded_n - n))
    slab = flat.reshape(rows_needed, LANE)

    cam_flat = cam_param.reshape(-1).astype(jnp.float32)   # (3,) for SMEM

    cp_kwargs = dict(dimension_semantics=("parallel",))
    if vmem_limit is not None:
        cp_kwargs["vmem_limit_bytes"] = vmem_limit

    out_slab = pl.pallas_call(
        cam_kernel,
        out_shape=jax.ShapeDtypeStruct((rows_needed, LANE), jnp.float32),
        grid=(num_blocks,),
        in_specs=[
            pl.BlockSpec(memory_space=pltpu.MemorySpace.SMEM),         # cam (3,)
            pl.BlockSpec((rows_per_block, LANE), lambda i: (i, 0)),    # xy slab
        ],
        out_specs=pl.BlockSpec((rows_per_block, LANE), lambda i: (i, 0)),
        compiler_params=pltpu.CompilerParams(**cp_kwargs),
    )(cam_flat, slab)

    out = out_slab.reshape(-1)
    if padded_n > n:
        out = out[:n]
    return out.reshape(B, J, 2).astype(pose3d.dtype)


def reference(pose3d, cam_param):
    out = pose3d[:, :, :2] + cam_param[None, :, 1:]
    out = out * cam_param[None, :, :1] * IMG_RES + IMG_RES
    return out


if __name__ == "__main__":
    key = jax.random.PRNGKey(0)
    k_cam, k1, k2, k3, k4 = jax.random.split(key, 5)

    # Deterministic "parameter" init (analog of torch.rand((1, 3))).
    cam_param = jax.random.uniform(k_cam, (1, 3), dtype=jnp.float32)

    # (batch, joints, xyz): small main test, odd-size tail test,
    # exact-LANE-multiple (no pad) test, multi-block + ragged-last-block test.
    shapes = [(2, 8, 3), (3, 17, 3), (4, 128, 3), (1040, 513, 3)]
    keys = [k1, k2, k3, k4]

    for shp, k in zip(shapes, keys):
        pose3d = jax.random.normal(k, shp, dtype=jnp.float32)
        out = jax.block_until_ready(optimize_cam_layer(pose3d, cam_param))
        ref = reference(pose3d, cam_param)
        assert out.shape == (shp[0], shp[1], 2), out.shape
        # atol widened slightly: the kernel folds the affine into x*s + bias,
        # which reassociates the f32 math vs the reference (values are O(100s)).
        assert jnp.allclose(out, ref, atol=2e-3, rtol=1e-5), f"mismatch at {shp}"

    print("KERNEL_OK")
</pallas_src>

<mosaic_0001>
module attributes {stable_mosaic.version = 11 : i64} {
  func.func @cam_kernel(%arg0: i32, %arg1: memref<3xf32, #tpu.memory_space<smem>>, %arg2: memref<1x1024xf32, #tpu.memory_space<vmem>>, %arg3: memref<1x1024xf32, #tpu.memory_space<vmem>>) attributes {dimension_semantics = [#tpu.dimension_semantics<parallel>], iteration_bounds = array<i64: 1>, scalar_prefetch = 0 : i64, scratch_operands = 0 : i64, tpu.core_type = #tpu.core_type<tc>, window_params = [{transform_indices = @transform_0, window_bounds = array<i64: 3>}, {transform_indices = @transform_1, window_bounds = array<i64: 1, 1024>}, {transform_indices = @transform_2, window_bounds = array<i64: 1, 1024>}]} {
    %c0 = arith.constant 0 : index
    %0 = memref.load %arg1[%c0] : memref<3xf32, #tpu.memory_space<smem>>
    %cst = arith.constant 2.500000e+02 : f32
    %1 = arith.mulf %0, %cst : f32
    %c1 = arith.constant 1 : index
    %2 = memref.load %arg1[%c1] : memref<3xf32, #tpu.memory_space<smem>>
    %3 = arith.mulf %2, %1 : f32
    %cst_0 = arith.constant 2.500000e+02 : f32
    %4 = arith.addf %3, %cst_0 : f32
    %c2 = arith.constant 2 : index
    %5 = memref.load %arg1[%c2] : memref<3xf32, #tpu.memory_space<smem>>
    %6 = arith.mulf %5, %1 : f32
    %cst_1 = arith.constant 2.500000e+02 : f32
    %7 = arith.addf %6, %cst_1 : f32
    %8 = tpu.iota {dimensions = array<i32: 1>} : vector<1x1024xi32>
    %c1_i32 = arith.constant 1 : i32
    %9 = vector.broadcast %c1_i32 : i32 to vector<1x1024xi32>
    %10 = arith.andi %8, %9 : vector<1x1024xi32>
    %c0_i32 = arith.constant 0 : i32
    %11 = vector.broadcast %c0_i32 : i32 to vector<1x1024xi32>
    %12 = arith.cmpi eq, %10, %11 : vector<1x1024xi32>
    %13 = vector.broadcast %4 : f32 to vector<1x1024xf32>
    %14 = vector.broadcast %7 : f32 to vector<1x1024xf32>
    %15 = arith.select %12, %13, %14 : vector<1x1024xi1>, vector<1x1024xf32>
    %c0_2 = arith.constant 0 : index
    %c0_3 = arith.constant 0 : index
    %16 = vector.load %arg2[%c0_2, %c0_3] : memref<1x1024xf32, #tpu.memory_space<vmem>>, vector<1x1024xf32>
    %17 = vector.broadcast %1 : f32 to vector<1x1024xf32>
    %18 = arith.mulf %16, %17 : vector<1x1024xf32>
    %19 = arith.addf %18, %15 : vector<1x1024xf32>
    %c0_4 = arith.constant 0 : index
    %c0_5 = arith.constant 0 : index
    %20 = vector.load %arg3[%c0_4, %c0_5] : memref<1x1024xf32, #tpu.memory_space<vmem>>, vector<1x1024xf32>
    tpu.vector_store %arg3[%c0_4, %c0_5], %19 {strides = array<i32>} : memref<1x1024xf32, #tpu.memory_space<vmem>>, vector<1x1024xf32>,
    return
  }
  func.func @transform_0(%arg0: i32) -> i32 {
    %c0_i32 = arith.constant 0 : i32
    %c0_i32_0 = arith.constant 0 : i32
    return %c0_i32 : i32
  }
  func.func @transform_1(%arg0: i32) -> (i32, i32) {
    %c0_i32 = arith.constant 0 : i32
    %c0_i32_0 = arith.constant 0 : i32
    return %arg0, %c0_i32 : i32, i32
  }
  func.func @transform_2(%arg0: i32) -> (i32, i32) {
    %c0_i32 = arith.constant 0 : i32
    %c0_i32_0 = arith.constant 0 : i32
    return %arg0, %c0_i32 : i32, i32
  }
}

</mosaic_0001>

<bundles_post_ra>
// kernel: optimize_cam_layer.1
= control target key start
LH: loop header
LB: loop body
LE: loop exit
PB: predicated region body
PF: predicated region fallthrough
CT: control target
= control target key end

     0   :  { %7 = vsyncpa [#allocation3], 0  ;;  %s226_s0 = inlined_call_operand.vmem [shape: f32[3], index: 0, kind: input, shape index: {}]   ;;  %s227_s1 = inlined_call_operand.vmem [shape: f32[1,1024], index: 1, kind: input, shape index: {}]   ;;  %s228_s2 = inlined_call_operand.vmem [shape: f32[1,1024], index: 2, kind: output, shape index: {}]  }
   0x1   :  { %s14_s11 = sshll.u32 %s226_s0, 4  ;;  %s15_s11 = int_to_ptr.vmem [resolvable:$true] %s14_s11 }
   0x2   :  { %s139_s12 = scalar_lea.vmem %s15_s11, 16  ;;  %p144_p1 = scmp.lt.s32.totalorder %s15_s11, %s15_s11 }
   0x3   :  { %p140_p0 = scmp.ne.s32.totalorder %s15_s11, %s139_s12  ;;  %p145_p2 = scmp.lt.s32.totalorder %s139_s12, %s139_s12 }
   0x5   :  { %p146_p3 = por %p145_p2, %p144_p1 }
   0x7   :  { %p147_p4 = pnand %p146_p3, %p140_p0 }
   0x9   :  { %150 = shalt.err (!%p147_p4)
}
   0xa   :  { %s153_s13 = smov [#allocation2]  }
   0xb   :  { %17 = dma.vmem_to_smem %s15_s11, 16, %s153_s13, [#allocation3]  }
   0xc   :  { %151 = dma.done.wait [#allocation3], 16  }
   0xd   :  { %152 = vsyncadd [#allocation3], 4294967280 }
   0xe   :  { %23 = sfence }
   0xf   :  { %s24_s14 = sld [smem:[#allocation2]]  ;;  %v32_v0 = vlaneseq  ;;  %v154_v9 = vmov 1966171168   ;;  %v67_v47 = vld [vmem:[%s227_s1] sm:$0xff] }
  0x10   :  { %s135_s15 = sld [smem:[#allocation2 + $0x1]]  ;;  %v83_v10 = vunpack.c.l.s4 %v154_v9 }
  0x11   :  { %s136_s16 = sld [smem:[#allocation2 + $0x2]]  ;;  %v33_v1 = vand.u32 127, %v32_v0  ;;  %v86_v20 = vshrl.u32 %v32_v0, 7 }
  0x12   :  { %v84_v19 = vunpack.c.0.s8 %v83_v10 }
  0x13   :  { %v34_v2 = vadd.s32 128, %v33_v1  ;;  %v35_v3 = vadd.s32 256, %v33_v1  ;;  %v36_v4 = vadd.s32 384, %v33_v1  ;;  %v37_v5 = vadd.s32 512, %v33_v1 }
  0x14   :  { %v38_v6 = vadd.s32 640, %v33_v1  ;;  %v39_v7 = vadd.s32 768, %v33_v1  ;;  %v40_v8 = vadd.s32 896, %v33_v1  ;;  %v41_v11 = vand.u32 1, %v33_v1 }
  0x15   :  { %s173_s0 = smul.f32 250.0, %s24_s14  ;;  %v42_v12 = vand.u32 1, %v34_v2  ;;  %v43_v13 = vand.u32 1, %v35_v3  ;;  %v44_v14 = vand.u32 1, %v36_v4  ;;  %v45_v15 = vand.u32 1, %v37_v5 }
  0x16   :  { %v46_v16 = vand.u32 1, %v38_v6  ;;  %v47_v17 = vand.u32 1, %v39_v7  ;;  %v48_v18 = vand.u32 1, %v40_v8  ;;  %vm177_vm0 = vcmp.eq.s32.totalorder %v41_v11, 0 }
  0x17   :  { %s27_s17 = smul.f32 %s135_s15, %s173_s0  ;;  %vm181_vm1 = vcmp.eq.s32.totalorder %v42_v12, 0  ;;  %vm185_vm2 = vcmp.eq.s32.totalorder %v43_v13, 0  ;;  %vm189_vm3 = vcmp.eq.s32.totalorder %v44_v14, 0  ;;  %vm193_vm4 = vcmp.eq.s32.totalorder %v45_v15, 0 }
  0x18   :  { %s30_s18 = smul.f32 %s136_s16, %s173_s0  ;;  %vm197_vm5 = vcmp.eq.s32.totalorder %v46_v16, 0  ;;  %vm201_vm6 = vcmp.eq.s32.totalorder %v47_v17, 0  ;;  %vm56_vm7 = vcmp.eq.s32.totalorder %v48_v18, 0  ;;  %v87_v30 = vsub.s32 %v84_v19, %v86_v20 }
  0x19   :  { %s28_s19 = sadd.f32 250.0, %s27_s17  ;;  %v68_v48 = vstv %s173_s0 }
  0x1a   :  { %s31_s20 = sadd.f32 250.0, %s30_s18  ;;  %v69_v51 = vmul.f32 %v68_v48, %v67_v47 }
  0x1b   :  { %v57_v28 = vstv %s28_s19 }
  0x1c   :  { %v58_v29 = vstv %s31_s20 }
  0x1d   :  { %v59_v31 = vsel %vm177_vm0, %v57_v28, %v58_v29  ;;  %v60_v32 = vsel %vm181_vm1, %v57_v28, %v58_v29  ;;  %v61_v33 = vsel %vm185_vm2, %v57_v28, %v58_v29  ;;  %v62_v34 = vsel %vm189_vm3, %v57_v28, %v58_v29 }
  0x1e   :  { %v63_v35 = vsel %vm193_vm4, %v57_v28, %v58_v29  ;;  %v64_v36 = vsel %vm197_vm5, %v57_v28, %v58_v29  ;;  %v65_v37 = vsel %vm201_vm6, %v57_v28, %v58_v29  ;;  %v66_v38 = vsel %vm56_vm7, %v57_v28, %v58_v29 }
  0x1f   :  { %v78_v39 = vcombine.low %v59_v31, %v60_v32  ;;  %v79_v40 = vcombine.low %v61_v33, %v62_v34  ;;  %v80_v41 = vcombine.low %v63_v35, %v64_v36  ;;  %v81_v42 = vcombine.low %v65_v37, %v66_v38 }
  0x21   :  { %v88_v43 = vrot.slane %v78_v39, %v87_v30  ;;  %v95_v44 = vrot.slane %v79_v40, %v87_v30  ;;  %v102_v45 = vrot.slane %v80_v41, %v87_v30  ;;  %v109_v46 = vrot.slane %v81_v42, %v87_v30 }
  0x23   :  { %v110_v49 = vcombine.low %v88_v43, %v95_v44  ;;  %v111_v50 = vcombine.low %v102_v45, %v109_v46 }
  0x25   :  { %v118_v52 = vrot.slane %v110_v49, %v87_v30  ;;  %v125_v53 = vrot.slane %v111_v50, %v87_v30 }
  0x27   :  { %v126_v54 = vcombine.low %v118_v52, %v125_v53 }
  0x29   :  { %v128_v55 = vadd.f32 %v126_v54, %v69_v51 }
  0x2b   :  { %129 = vst [vmem:[%s228_s2] sm:$0xff] %v128_v55 }
  0x2c   :  { %134 = vsyncpa [#allocation3], 1 }

</bundles_post_ra>
